<compile_context>
chip_gen: v7x
topology: tpu7x:2x2x1
jax: 0.10.0
libtpu: 0.0.40
codegen_flags: <defaults>
</compile_context>

<pallas_src>
import functools

import jax
import jax.numpy as jnp
from jax import lax
from jax.experimental import pallas as pl
from jax.experimental.pallas import tpu as pltpu

LANES = 128
SUBLANES = 8
MAX_BLOCK_ROWS = 4096                  # (4096, 128) f32 tile = 2 MiB per input
VMEM_LIMIT_BYTES = 32 * 1024 * 1024    # explicit scoped-VMEM budget


def _is_two_tensorcore_chip():
    """Best-effort detection of a 2-TensorCore chip (v7x); default False."""
    try:
        kind = jax.devices()[0].device_kind.lower()
        return ("tpu" in kind) and ("7" in kind)
    except Exception:
        return False


def _loss_kernel(mse_ref, var_ref, out_ref, acc_ref, *,
                 block_rows, blocks_per_shard, total_blocks, valid_rows,
                 last_block_partial):
    s = pl.program_id(0)   # shard (parallel axis; size 1 on single-TC chips)
    i = pl.program_id(1)   # row-block within shard (reduction axis)
    linear_block = s * blocks_per_shard + i

    @pl.when(i == 0)
    def _():
        acc_ref[...] = jnp.zeros_like(acc_ref)

    def term():
        # Cast on the loaded tile (inputs stream in native dtype).
        mse = mse_ref[...].astype(jnp.float32)
        var = var_ref[...].astype(jnp.float32)
        # mse/(2*var) + 0.5*log(var) == 0.5*(mse*(1/var) + log(var));
        # approx reciprocal -> single EUP vrcp instead of an f32 divide.
        return 0.5 * (mse * pl.reciprocal(var, approx=True) + jnp.log(var))

    def fold(t):
        # (block_rows, 128) -> (8, 128): pure elementwise VPU adds (sublane
        # groups stacked), no per-step cross-lane/sublane reduce.
        return t.reshape(block_rows // SUBLANES, SUBLANES, LANES).sum(axis=0)

    full_limit = total_blocks - 1 if last_block_partial else total_blocks

    # Steady-state blocks: completely mask-free.  The wrapper pads the tail
    # with (mse=0, var=1), which contributes exactly 0 to the sum.
    @pl.when(linear_block < full_limit)
    def _():
        acc_ref[...] += fold(term())

    if last_block_partial:
        # Last (partial) block only: mask rows past the valid row count.
        # Out-of-range rows hold garbage; jnp.where is a select, so NaN/inf
        # from the unselected branch cannot propagate.
        @pl.when(linear_block == total_blocks - 1)
        def _():
            t = term()
            row = lax.broadcasted_iota(jnp.int32, t.shape, 0)
            t = jnp.where(linear_block * block_rows + row < valid_rows, t, 0.0)
            acc_ref[...] += fold(t)

    # Clamped overflow blocks (linear_block >= total_blocks; only when the
    # 2-way shard split is uneven) skip all compute; only their re-DMA is paid.

    @pl.when(i == pl.num_programs(1) - 1)
    def _():
        # Lane-dense (8, 128) partial-sum slab per shard; combined and divided
        # by N in the wrapper.
        out_ref[...] = acc_ref[...]


def mse_with_variance_constraint(mse_value, variance, *, num_shards=None):
    """Pallas implementation of MSEWithVarianceConstraint.forward.

    Returns a scalar float32, matching torch.mean semantics.
    """
    assert mse_value.shape == variance.shape
    n = mse_value.size

    mse_flat = jnp.ravel(mse_value)
    var_flat = jnp.ravel(variance)

    # Pad the flat length up to a multiple of 8*128 so the lane-dense 2-D view
    # has rows % 8 == 0.  Pad constants (mse=0, var=1) contribute exactly 0,
    # so the kernel's steady-state loop needs no mask at all.
    chunk = SUBLANES * LANES
    rem = n % chunk
    if rem:
        pad = chunk - rem
        mse_flat = jnp.pad(mse_flat, (0, pad), constant_values=0)
        var_flat = jnp.pad(var_flat, (0, pad), constant_values=1)

    rows = mse_flat.shape[0] // LANES
    mse2d = mse_flat.reshape(rows, LANES)
    var2d = var_flat.reshape(rows, LANES)

    # Block: either the full row extent (small inputs) or a large (4096, 128)
    # tile (multiple of (16, 128), so it also conforms for bf16 inputs).
    block_rows = min(rows, MAX_BLOCK_ROWS)
    total_blocks = pl.cdiv(rows, block_rows)
    last_block_partial = (rows % block_rows) != 0

    # 2-way shard axis only on 2-TensorCore chips (v7x); on v5e/v6e a second
    # shard would only add a clamped block of wasted DMA.
    if num_shards is None:
        num_shards = 2 if _is_two_tensorcore_chip() else 1
    num_shards = max(1, min(num_shards, total_blocks))
    blocks_per_shard = pl.cdiv(total_blocks, num_shards)

    kernel = functools.partial(
        _loss_kernel,
        block_rows=block_rows,
        blocks_per_shard=blocks_per_shard,
        total_blocks=total_blocks,
        valid_rows=rows,
        last_block_partial=last_block_partial,
    )

    def in_map(s, i):
        # Clamp overflow blocks (uneven shard split) onto the last real block;
        # the kernel skips their compute entirely.
        return (jnp.minimum(s * blocks_per_shard + i, total_blocks - 1), 0)

    out = pl.pallas_call(
        kernel,
        out_shape=jax.ShapeDtypeStruct((num_shards * SUBLANES, LANES),
                                       jnp.float32),
        grid_spec=pltpu.PrefetchScalarGridSpec(
            num_scalar_prefetch=0,
            grid=(num_shards, blocks_per_shard),
            in_specs=[
                pl.BlockSpec((block_rows, LANES), in_map),
                pl.BlockSpec((block_rows, LANES), in_map),
            ],
            out_specs=pl.BlockSpec((SUBLANES, LANES), lambda s, i: (s, 0)),
            scratch_shapes=[pltpu.VMEM((SUBLANES, LANES), jnp.float32)],
        ),
        compiler_params=pltpu.CompilerParams(
            dimension_semantics=("parallel", "arbitrary"),
            vmem_limit_bytes=VMEM_LIMIT_BYTES,
        ),
    )(mse2d, var2d)

    # Combine shard partial-sum slabs and take the mean over the true count.
    return jnp.sum(out) / jnp.float32(n)


if __name__ == "__main__":
    key = jax.random.PRNGKey(0)
    k1, k2 = jax.random.split(key)

    # Small shapes consistent with the module: per-element MSE map and
    # predicted variance map, e.g. (batch=2, channels=4, H=16, W=16).
    shape = (2, 4, 16, 16)
    mse_value = jax.random.uniform(k1, shape, dtype=jnp.float32) * 2.0 + 0.1
    variance = jax.random.uniform(k2, shape, dtype=jnp.float32) * 1.5 + 0.2

    loss = mse_with_variance_constraint(mse_value, variance)
    jax.block_until_ready(loss)

    # Reference check in plain JAX (same math as the PyTorch module).
    # Tolerance slightly relaxed because pl.reciprocal(approx=True) differs
    # from an exact f32 divide at ~1e-5 relative level.
    ref = jnp.mean(mse_value / (2.0 * variance) + 0.5 * jnp.log(variance))
    assert jnp.allclose(loss, ref, rtol=1e-3, atol=1e-4), (loss, ref)

    print("KERNEL_OK")
</pallas_src>

<mosaic_0001>
module attributes {stable_mosaic.version = 11 : i64} {
  func.func @_loss_kernel(%arg0: i32, %arg1: i32, %arg2: memref<16x128xf32, #tpu.memory_space<vmem>>, %arg3: memref<16x128xf32, #tpu.memory_space<vmem>>, %arg4: memref<8x128xf32, #tpu.memory_space<vmem>>, %arg5: memref<8x128xf32, #tpu.memory_space<vmem>>) attributes {dimension_semantics = [#tpu.dimension_semantics<parallel>, #tpu.dimension_semantics<arbitrary>], iteration_bounds = array<i64: 1, 1>, scalar_prefetch = 0 : i64, scratch_operands = 1 : i64, tpu.core_type = #tpu.core_type<tc>, window_params = [{transform_indices = @transform_0, window_bounds = array<i64: 16, 128>}, {transform_indices = @transform_1, window_bounds = array<i64: 16, 128>}, {transform_indices = @transform_2, window_bounds = array<i64: 8, 128>}]} {
    %c1_i32 = arith.constant 1 : i32
    %0 = arith.muli %arg0, %c1_i32 : i32
    %1 = arith.addi %0, %arg1 : i32
    %c0_i32 = arith.constant 0 : i32
    %2 = arith.cmpi eq, %arg1, %c0_i32 : i32
    %3 = arith.extui %2 : i1 to i32
    %c0_i32_0 = arith.constant 0 : i32
    %4 = arith.cmpi ne, %3, %c0_i32_0 : i32
    scf.if %4 {
      %cst = arith.constant 0.000000e+00 : f32
      %11 = vector.broadcast %cst : f32 to vector<8x128xf32>
      %c0 = arith.constant 0 : index
      %c0_5 = arith.constant 0 : index
      %12 = vector.load %arg5[%c0, %c0_5] : memref<8x128xf32, #tpu.memory_space<vmem>>, vector<8x128xf32>
      tpu.vector_store %arg5[%c0, %c0_5], %11 {strides = array<i32>} : memref<8x128xf32, #tpu.memory_space<vmem>>, vector<8x128xf32>,
    } else {
    }
    %c1_i32_1 = arith.constant 1 : i32
    %5 = arith.cmpi slt, %1, %c1_i32_1 : i32
    %6 = arith.extui %5 : i1 to i32
    %c0_i32_2 = arith.constant 0 : i32
    %7 = arith.cmpi ne, %6, %c0_i32_2 : i32
    scf.if %7 {
      %c0 = arith.constant 0 : index
      %c0_5 = arith.constant 0 : index
      %11 = vector.load %arg5[%c0, %c0_5] : memref<8x128xf32, #tpu.memory_space<vmem>>, vector<8x128xf32>
      %c0_6 = arith.constant 0 : index
      %c0_7 = arith.constant 0 : index
      %12 = vector.load %arg2[%c0_6, %c0_7] : memref<16x128xf32, #tpu.memory_space<vmem>>, vector<16x128xf32>
      %c0_8 = arith.constant 0 : index
      %c0_9 = arith.constant 0 : index
      %13 = vector.load %arg3[%c0_8, %c0_9] : memref<16x128xf32, #tpu.memory_space<vmem>>, vector<16x128xf32>
      %14 = tpu.reciprocal %13 {approx = true} : vector<16x128xf32> -> vector<16x128xf32>
      %15 = arith.mulf %12, %14 : vector<16x128xf32>
      %16 = math.log %13 : vector<16x128xf32>
      %17 = arith.addf %15, %16 : vector<16x128xf32>
      %cst = arith.constant 5.000000e-01 : f32
      %18 = vector.broadcast %cst : f32 to vector<16x128xf32>
      %19 = arith.mulf %18, %17 : vector<16x128xf32>
      %20 = vector.shape_cast %19 : vector<16x128xf32> to vector<2x8x128xf32>
      %cst_10 = arith.constant dense<0.000000e+00> : vector<8x128xf32>
      %21 = vector.multi_reduction <add>, %20, %cst_10 [0] : vector<2x8x128xf32> to vector<8x128xf32>
      %22 = arith.addf %11, %21 : vector<8x128xf32>
      %c0_11 = arith.constant 0 : index
      %c0_12 = arith.constant 0 : index
      %23 = vector.load %arg5[%c0_11, %c0_12] : memref<8x128xf32, #tpu.memory_space<vmem>>, vector<8x128xf32>
      tpu.vector_store %arg5[%c0_11, %c0_12], %22 {strides = array<i32>} : memref<8x128xf32, #tpu.memory_space<vmem>>, vector<8x128xf32>,
    } else {
    }
    %c0_i32_3 = arith.constant 0 : i32
    %8 = arith.cmpi eq, %arg1, %c0_i32_3 : i32
    %9 = arith.extui %8 : i1 to i32
    %c0_i32_4 = arith.constant 0 : i32
    %10 = arith.cmpi ne, %9, %c0_i32_4 : i32
    scf.if %10 {
      %c0 = arith.constant 0 : index
      %c0_5 = arith.constant 0 : index
      %11 = vector.load %arg5[%c0, %c0_5] : memref<8x128xf32, #tpu.memory_space<vmem>>, vector<8x128xf32>
      %c0_6 = arith.constant 0 : index
      %c0_7 = arith.constant 0 : index
      %12 = vector.load %arg4[%c0_6, %c0_7] : memref<8x128xf32, #tpu.memory_space<vmem>>, vector<8x128xf32>
      tpu.vector_store %arg4[%c0_6, %c0_7], %11 {strides = array<i32>} : memref<8x128xf32, #tpu.memory_space<vmem>>, vector<8x128xf32>,
    } else {
    }
    return
  }
  func.func @transform_0(%arg0: i32, %arg1: i32) -> (i32, i32) {
    %c1_i32 = arith.constant 1 : i32
    %0 = arith.muli %arg0, %c1_i32 : i32
    %1 = arith.addi %0, %arg1 : i32
    %c0_i32 = arith.constant 0 : i32
    %2 = arith.minsi %1, %c0_i32 : i32
    %c0_i32_0 = arith.constant 0 : i32
    %c0_i32_1 = arith.constant 0 : i32
    return %2, %c0_i32_0 : i32, i32
  }
  func.func @transform_1(%arg0: i32, %arg1: i32) -> (i32, i32) {
    %c1_i32 = arith.constant 1 : i32
    %0 = arith.muli %arg0, %c1_i32 : i32
    %1 = arith.addi %0, %arg1 : i32
    %c0_i32 = arith.constant 0 : i32
    %2 = arith.minsi %1, %c0_i32 : i32
    %c0_i32_0 = arith.constant 0 : i32
    %c0_i32_1 = arith.constant 0 : i32
    return %2, %c0_i32_0 : i32, i32
  }
  func.func @transform_2(%arg0: i32, %arg1: i32) -> (i32, i32) {
    %c0_i32 = arith.constant 0 : i32
    %c0_i32_0 = arith.constant 0 : i32
    return %arg0, %c0_i32 : i32, i32
  }
}

</mosaic_0001>

<bundles_post_ra>
// kernel: tpu_custom_call.1
= control target key start
LH: loop header
LB: loop body
LE: loop exit
PB: predicated region body
PF: predicated region fallthrough
CT: control target
= control target key end

     0   :  { %7 = vsyncpa [#allocation4], 0  ;;  %s256_s0 = inlined_call_operand.hbm [shape: f32[16,128], index: 0, kind: input, shape index: {}]   ;;  %s257_s1 = inlined_call_operand.hbm [shape: f32[16,128], index: 1, kind: input, shape index: {}]   ;;  %s258_s2 = inlined_call_operand.hbm [shape: f32[8,128], index: 2, kind: output, shape index: {}]  }
   0x1   :  { %8 = vsyncpa [#allocation7], 0 }
   0x2   :  { %9 = vsyncpa [#allocation5], 0  ;;  %s200_s9 = smov [#allocation3]   ;;  %s128_s13 = scalar_lea.hbm %s256_s0, 256 }
   0x3   :  { %s21_s10 = sshll.u32 %s200_s9, 4  ;;  %p129_p0 = scmp.ne.s32.totalorder %s256_s0, %s128_s13  ;;  %s22_s10 = int_to_ptr.vmem [resolvable:$true] %s21_s10 }
   0x4   :  { %p132_p1 = scmp.lt.u32.totalorder %s128_s13, %s256_s0 }
   0x6   :  { %p134_p2 = pnand %p132_p1, %p129_p0 }
   0x8   :  { %137 = shalt.err (!%p134_p2)
}
   0x9   :  { %s138_s18 = scalar_lea.vmem %s22_s10, 256  ;;  %p143_p4 = scmp.lt.s32.totalorder %s22_s10, %s22_s10 }
   0xa   :  { %p139_p3 = scmp.ne.s32.totalorder %s22_s10, %s138_s18  ;;  %p144_p5 = scmp.lt.s32.totalorder %s138_s18, %s138_s18 }
   0xc   :  { %p145_p6 = por %p144_p5, %p143_p4 }
   0xe   :  { %p146_p7 = pnand %p145_p6, %p139_p3 }
  0x10   :  { %149 = shalt.err (!%p146_p7)
}
  0x11   :  { %s201_s19 = smov 128   ;;  %s202_s20 = smov 8  }
  0x12   :  { %27 = dma.hbm_to_vmem [thread:$0]  %s256_s0, 256, %s22_s10, [#allocation4], %s201_s19, %s201_s19, %s202_s20  }
  0x13   :  { %s203_s23 = smov [#allocation6]   ;;  %s150_s27 = scalar_lea.hbm %s257_s1, 256 }
  0x14   :  { %s39_s24 = sshll.u32 %s203_s23, 4  ;;  %p151_p8 = scmp.ne.s32.totalorder %s257_s1, %s150_s27  ;;  %s40_s24 = int_to_ptr.vmem [resolvable:$true] %s39_s24 }
  0x15   :  { %p154_p9 = scmp.lt.u32.totalorder %s150_s27, %s257_s1 }
  0x17   :  { %p156_p10 = pnand %p154_p9, %p151_p8 }
  0x19   :  { %159 = shalt.err (!%p156_p10)
}
  0x1a   :  { %s160_s4 = scalar_lea.vmem %s40_s24, 256  ;;  %p165_p12 = scmp.lt.s32.totalorder %s40_s24, %s40_s24 }
  0x1b   :  { %p161_p11 = scmp.ne.s32.totalorder %s40_s24, %s160_s4  ;;  %p166_p13 = scmp.lt.s32.totalorder %s160_s4, %s160_s4 }
  0x1d   :  { %p167_p0 = por %p166_p13, %p165_p12 }
  0x1f   :  { %p168_p1 = pnand %p167_p0, %p161_p11 }
  0x21   :  { %171 = shalt.err (!%p168_p1)
}
  0x22   :  { %45 = dma.hbm_to_vmem [thread:$0]  %s257_s1, 256, %s40_s24, [#allocation7], %s201_s19, %s201_s19, %s202_s20  }
  0x23   :  { %194 = dma.done.wait [#allocation4], 256  }
  0x24   :  { %195 = vsyncadd [#allocation4], 4294967040 }
  0x25   :  { %196 = dma.done.wait [#allocation7], 256  }
  0x26   :  { %197 = vsyncadd [#allocation7], 4294967040  ;;  %v73_v0 = vld [vmem:[#allocation6] sm:$0xff]  ;;  %v74_v1 = vld [vmem:[#allocation6 + $0x8] sm:$0xff]  ;;  %s204_s1 = smov [#allocation8]  }
  0x27   :  { %120 = vrcp.f32 %v73_v0  ;;  %v71_v2 = vld [vmem:[#allocation3] sm:$0xff]  ;;  %v72_v3 = vld [vmem:[#allocation3 + $0x8] sm:$0xff]  ;;  %s101_s6 = sshll.u32 %s204_s1, 4  ;;  %s102_s6 = int_to_ptr.vmem [resolvable:$true] %s101_s6 }
  0x28   :  { %122 = vrcp.f32 %v74_v1  ;;  %s172_s7 = scalar_lea.vmem %s102_s6, 128  ;;  %p177_p3 = scmp.lt.s32.totalorder %s102_s6, %s102_s6 }
  0x29   :  { %124 = vlog2.f32 %v73_v0  ;;  %p173_p2 = scmp.ne.s32.totalorder %s102_s6, %s172_s7  ;;  %p178_p4 = scmp.lt.s32.totalorder %s172_s7, %s172_s7 }
  0x2a   :  { %126 = vlog2.f32 %v74_v1 }
  0x2b   :  { %p179_p5 = por %p178_p4, %p177_p3 }
  0x2d   :  { %p180_p6 = pnand %p179_p5, %p173_p2 }
  0x31   :  { %v121_v4 = vpop.eup %120 }
  0x32   :  { %v123_v5 = vpop.eup %122  ;;  %v77_v6 = vmul.f32 %v121_v4, %v71_v2 }
  0x33   :  { %v125_v7 = vpop.eup %124  ;;  %v78_v8 = vmul.f32 %v123_v5, %v72_v3 }
  0x34   :  { %v127_v9 = vpop.eup %126  ;;  %v80_v10 = vmul.f32 0.6931472, %v125_v7 }
  0x35   :  { %v82_v11 = vmul.f32 0.6931472, %v127_v9 }
  0x36   :  { %v83_v12 = vadd.f32 %v80_v10, %v77_v6 }
  0x37   :  { %v84_v13 = vadd.f32 %v82_v11, %v78_v8 }
  0x38   :  { %v85_v14 = vmul.f32 0.5, %v83_v12 }
  0x39   :  { %v86_v15 = vmul.f32 0.5, %v84_v13 }
  0x3b   :  { %v87_v16 = vadd.f32 %v86_v15, %v85_v14 }
  0x3d   :  { %94 = vst [vmem:[#allocation8] sm:$0xff] %v87_v16 }
  0x3e   :  { %183 = shalt.err (!%p180_p6)
}
  0x3f   :  { %s184_s10 = scalar_lea.hbm %s258_s2, 128 }
  0x40   :  { %p185_p7 = scmp.ne.s32.totalorder %s258_s2, %s184_s10  ;;  %p188_p8 = scmp.lt.u32.totalorder %s184_s10, %s258_s2 }
  0x42   :  { %p190_p9 = pnand %p188_p8, %p185_p7 }
  0x44   :  { %193 = shalt.err (!%p190_p9)
}
  0x45   :  { %104 = dma.vmem_to_hbm [thread:$0]  %s102_s6, 128, %s258_s2, [#allocation5]  }
  0x46   :  { %198 = dma.done.wait [#allocation5], 128  }
  0x47   :  { %199 = vsyncadd [#allocation5], 4294967168 }
  0x48   :  { %108 = vsyncpa [#allocation4], 1 }
  0x49   :  { %109 = vsyncpa [#allocation7], 1 }
  0x4a   :  { %110 = vsyncpa [#allocation5], 1 }

</bundles_post_ra>
